<compile_context>
chip_gen: v5e
topology: v5e:2x2
jax: 0.10.0
libtpu: 0.0.40
codegen_flags: <defaults>
</compile_context>

<pallas_src>
import jax
import jax.numpy as jnp
from jax.experimental import pallas as pl
from jax.experimental.pallas import tpu as pltpu

INPUT_DIM = 128
HIDDEN_DIM = 54
NEG_SLOPE = 0.01  # torch.nn.LeakyReLU default


def _round_up(a, b):
    return (a + b - 1) // b * b


def decoder_kernel(x_ref, w1_ref, b1_ref, w2_ref, b2_ref, o_ref):
    x = x_ref[...]                                         # (tm, D) f32
    # Layer 1 on the MXU, f32 accumulation.
    h = jnp.dot(x, w1_ref[...],
                preferred_element_type=jnp.float32)        # (tm, Hp)
    h = h + b1_ref[...]                                    # broadcast (1, Hp)
    h = jnp.where(h > 0, h, NEG_SLOPE * h)                 # LeakyReLU (VPU)
    # Layer 2 as W2 @ h^T (NT matmul, q@k^T-style) -> batch lands on lanes,
    # giving a lane-dense (1, tm) output row instead of a (tm, 1) column.
    o8 = jax.lax.dot_general(
        w2_ref[...], h,                                    # (8, Hp) x (tm, Hp)
        dimension_numbers=(((1,), (1,)), ((), ())),
        preferred_element_type=jnp.float32)                # (8, tm); rows 1..7 are zero pad
    o_row = o8[0:1, :] + b2_ref[0]                         # (1, tm)
    o_ref[...] = o_row.astype(o_ref.dtype)


def decoder_forward(x, w1, b1, w2, b2, *, tm=2048):
    """Decoder forward pass.

    x : (B, D)  float32
    w1: (D, H)  first Linear weight, stored transposed (in_features, out_features)
    b1: (1, H)
    w2: (1, H)  second Linear weight in torch layout (out_features=1, in_features=H)
    b2: (1,)
    """
    B, D = x.shape
    H = w1.shape[1]
    Hp = _round_up(H, 128)

    # Large, 128-aligned batch tile (mem-bound kernel).  tm=2048 -> 1 MiB f32
    # x-tile, 2 MiB double-buffered: trivial even for v7x VMEM.
    tm = _round_up(max(1, min(tm, B)), 128)
    B_pad = _round_up(B, tm)
    if B_pad != B:
        x = jnp.pad(x, ((0, B_pad - B), (0, 0)))
    grid = (B_pad // tm,)

    # One-time zero padding of the tiny parameters so all in-kernel shapes are
    # (multiple-of-8, multiple-of-128).  Zeros are exact through LeakyReLU and
    # the contractions.
    w1p = jnp.pad(w1, ((0, 0), (0, Hp - H)))
    b1p = jnp.pad(b1, ((0, 0), (0, Hp - H)))
    w2p = jnp.pad(w2, ((0, 8 - w2.shape[0]), (0, Hp - H)))
    b2 = b2.reshape((1,))

    flops = 2 * B_pad * D * Hp + 2 * B_pad * Hp
    bytes_accessed = 4 * (B_pad * D + D * Hp + 9 * Hp + 1 + B_pad)

    out = pl.pallas_call(
        decoder_kernel,
        out_shape=jax.ShapeDtypeStruct((1, B_pad), x.dtype),
        grid=grid,
        in_specs=[
            pl.BlockSpec((tm, D), lambda i: (i, 0)),            # x: streamed over batch
            pl.BlockSpec((D, Hp), lambda i: (0, 0)),            # W1: resident
            pl.BlockSpec((1, Hp), lambda i: (0, 0)),            # b1
            pl.BlockSpec((8, Hp), lambda i: (0, 0)),            # W2 (row-padded to 8)
            pl.BlockSpec(memory_space=pltpu.MemorySpace.SMEM),  # b2 scalar in SMEM
        ],
        out_specs=pl.BlockSpec((1, tm), lambda i: (0, i)),      # lane-dense output row
        compiler_params=pltpu.CompilerParams(
            dimension_semantics=("parallel",)),
        cost_estimate=pl.CostEstimate(
            flops=int(flops), transcendentals=0,
            bytes_accessed=int(bytes_accessed)),
    )(x, w1p, b1p, w2p, b2)

    # (1, B_pad) row -> (B, 1) column, dropping batch padding.
    return out[0, :B][:, None]


def init_params(key, input_dim=INPUT_DIM, hidden_dim=HIDDEN_DIM):
    # Mimic torch.nn.Linear's U(-1/sqrt(fan_in), 1/sqrt(fan_in)) init.
    k1, k2, k3, k4 = jax.random.split(key, 4)
    bound1 = 1.0 / (input_dim ** 0.5)
    bound2 = 1.0 / (hidden_dim ** 0.5)
    w1 = jax.random.uniform(k1, (input_dim, hidden_dim), jnp.float32,
                            -bound1, bound1)                 # (in, out) = W1^T
    b1 = jax.random.uniform(k2, (1, hidden_dim), jnp.float32, -bound1, bound1)
    w2 = jax.random.uniform(k3, (1, hidden_dim), jnp.float32,
                            -bound2, bound2)                 # torch layout (out=1, in)
    b2 = jax.random.uniform(k4, (1,), jnp.float32, -bound2, bound2)
    return w1, b1, w2, b2


def decoder_ref(x, w1, b1, w2, b2):
    h = x @ w1 + b1
    h = jnp.where(h > 0, h, NEG_SLOPE * h)
    return h @ w2.T + b2


if __name__ == "__main__":
    key = jax.random.PRNGKey(0)
    kx, kx2, kp = jax.random.split(key, 3)

    w1, b1, w2, b2 = init_params(kp)

    # Small batch (single tile, exercises padding 16 -> 128).
    B = 16
    x = jax.random.normal(kx, (B, INPUT_DIM), jnp.float32)
    out = jax.block_until_ready(decoder_forward(x, w1, b1, w2, b2))
    ref = decoder_ref(x, w1, b1, w2, b2)
    assert out.shape == (B, 1)
    assert jnp.allclose(out, ref, atol=1e-4, rtol=1e-4)

    # Non-divisible batch with a multi-step grid (tm=128 -> 3 tiles, tail pad).
    B2 = 300
    x2 = jax.random.normal(kx2, (B2, INPUT_DIM), jnp.float32)
    out2 = jax.block_until_ready(decoder_forward(x2, w1, b1, w2, b2, tm=128))
    ref2 = decoder_ref(x2, w1, b1, w2, b2)
    assert out2.shape == (B2, 1)
    assert jnp.allclose(out2, ref2, atol=1e-4, rtol=1e-4)

    print("KERNEL_OK")
</pallas_src>

<mosaic_0001>
module attributes {stable_mosaic.version = 11 : i64} {
  func.func @decoder_kernel(%arg0: i32, %arg1: memref<128x128xf32, #tpu.memory_space<vmem>>, %arg2: memref<128x128xf32, #tpu.memory_space<vmem>>, %arg3: memref<1x128xf32, #tpu.memory_space<vmem>>, %arg4: memref<8x128xf32, #tpu.memory_space<vmem>>, %arg5: memref<1xf32, #tpu.memory_space<smem>>, %arg6: memref<1x128xf32, #tpu.memory_space<vmem>>) attributes {dimension_semantics = [#tpu.dimension_semantics<parallel>], iteration_bounds = array<i64: 1>, scalar_prefetch = 0 : i64, scratch_operands = 0 : i64, tpu.core_type = #tpu.core_type<tc>, window_params = [{transform_indices = @transform_0, window_bounds = array<i64: 128, 128>}, {pipeline_mode = #tpu.pipeline_mode<synchronous>, transform_indices = @transform_1, window_bounds = array<i64: 128, 128>}, {pipeline_mode = #tpu.pipeline_mode<synchronous>, transform_indices = @transform_2, window_bounds = array<i64: 1, 128>}, {pipeline_mode = #tpu.pipeline_mode<synchronous>, transform_indices = @transform_3, window_bounds = array<i64: 8, 128>}, {transform_indices = @transform_4, window_bounds = array<i64: 1>}, {transform_indices = @transform_5, window_bounds = array<i64: 1, 128>}]} {
    %c0 = arith.constant 0 : index
    %c0_0 = arith.constant 0 : index
    %0 = vector.load %arg1[%c0, %c0_0] : memref<128x128xf32, #tpu.memory_space<vmem>>, vector<128x128xf32>
    %c0_1 = arith.constant 0 : index
    %c0_2 = arith.constant 0 : index
    %1 = vector.load %arg2[%c0_1, %c0_2] : memref<128x128xf32, #tpu.memory_space<vmem>>, vector<128x128xf32>
    %cst = arith.constant dense<0.000000e+00> : vector<128x128xf32>
    %2 = tpu.matmul %0, %1, %cst {dimension_numbers = #tpu.dot_dimension_numbers<[1], [0], [0], [1], [0, 0, 1, 1], [], []>} : vector<128x128xf32>, vector<128x128xf32>, vector<128x128xf32> -> vector<128x128xf32>
    %c0_3 = arith.constant 0 : index
    %c0_4 = arith.constant 0 : index
    %3 = vector.load %arg3[%c0_3, %c0_4] : memref<1x128xf32, #tpu.memory_space<vmem>>, vector<1x128xf32>
    %4 = vector.broadcast %3 : vector<1x128xf32> to vector<128x128xf32>
    %5 = arith.addf %2, %4 : vector<128x128xf32>
    %cst_5 = arith.constant 0.000000e+00 : f32
    %6 = vector.broadcast %cst_5 : f32 to vector<128x128xf32>
    %7 = arith.cmpf ogt, %5, %6 : vector<128x128xf32>
    %cst_6 = arith.constant 0.00999999977 : f32
    %8 = vector.broadcast %cst_6 : f32 to vector<128x128xf32>
    %9 = arith.mulf %8, %5 : vector<128x128xf32>
    %10 = arith.select %7, %5, %9 : vector<128x128xi1>, vector<128x128xf32>
    %c0_7 = arith.constant 0 : index
    %c0_8 = arith.constant 0 : index
    %11 = vector.load %arg4[%c0_7, %c0_8] : memref<8x128xf32, #tpu.memory_space<vmem>>, vector<8x128xf32>
    %cst_9 = arith.constant dense<0.000000e+00> : vector<8x128xf32>
    %12 = tpu.matmul %11, %10, %cst_9 {dimension_numbers = #tpu.dot_dimension_numbers<[1], [1], [0], [0], [0, 0, 1, 0], [], []>} : vector<8x128xf32>, vector<128x128xf32>, vector<8x128xf32> -> vector<8x128xf32>
    %13 = vector.extract_strided_slice %12 {offsets = [0, 0], sizes = [1, 128], strides = [1, 1]} : vector<8x128xf32> to vector<1x128xf32>
    %c0_10 = arith.constant 0 : index
    %14 = memref.load %arg5[%c0_10] : memref<1xf32, #tpu.memory_space<smem>>
    %15 = vector.broadcast %14 : f32 to vector<1x128xf32>
    %16 = arith.addf %13, %15 : vector<1x128xf32>
    %c0_11 = arith.constant 0 : index
    %c0_12 = arith.constant 0 : index
    %17 = vector.load %arg6[%c0_11, %c0_12] : memref<1x128xf32, #tpu.memory_space<vmem>>, vector<1x128xf32>
    tpu.vector_store %arg6[%c0_11, %c0_12], %16 {strides = array<i32>} : memref<1x128xf32, #tpu.memory_space<vmem>>, vector<1x128xf32>,
    return
  }
  func.func @transform_0(%arg0: i32) -> (i32, i32) {
    %c0_i32 = arith.constant 0 : i32
    %c0_i32_0 = arith.constant 0 : i32
    return %arg0, %c0_i32 : i32, i32
  }
  func.func @transform_1(%arg0: i32) -> (i32, i32) {
    %c0_i32 = arith.constant 0 : i32
    %c0_i32_0 = arith.constant 0 : i32
    %c0_i32_1 = arith.constant 0 : i32
    return %c0_i32, %c0_i32_0 : i32, i32
  }
  func.func @transform_2(%arg0: i32) -> (i32, i32) {
    %c0_i32 = arith.constant 0 : i32
    %c0_i32_0 = arith.constant 0 : i32
    %c0_i32_1 = arith.constant 0 : i32
    return %c0_i32, %c0_i32_0 : i32, i32
  }
  func.func @transform_3(%arg0: i32) -> (i32, i32) {
    %c0_i32 = arith.constant 0 : i32
    %c0_i32_0 = arith.constant 0 : i32
    %c0_i32_1 = arith.constant 0 : i32
    return %c0_i32, %c0_i32_0 : i32, i32
  }
  func.func @transform_4(%arg0: i32) -> i32 {
    %c0_i32 = arith.constant 0 : i32
    %c0_i32_0 = arith.constant 0 : i32
    return %c0_i32 : i32
  }
  func.func @transform_5(%arg0: i32) -> (i32, i32) {
    %c0_i32 = arith.constant 0 : i32
    %c0_i32_0 = arith.constant 0 : i32
    return %c0_i32, %arg0 : i32, i32
  }
}

</mosaic_0001>

<bundles_post_ra>
// kernel: tpu_custom_call.1
= control target key start
LH: loop header
LB: loop body
LE: loop exit
PB: predicated region body
PF: predicated region fallthrough
CT: control target
= control target key end

     0   :  { %11 = vsyncpa [#allocation4], 0  ;;  %s475_s0 = inlined_call_operand.hbm [shape: f32[128,128], index: 0, kind: input, shape index: {}]   ;;  %s476_s1 = inlined_call_operand.hbm [shape: f32[128,128], index: 1, kind: input, shape index: {}]   ;;  %s477_s2 = inlined_call_operand.vmem [shape: f32[1,128], index: 2, kind: input, shape index: {}]   ;;  %s478_s3 = inlined_call_operand.hbm [shape: f32[8,128], index: 3, kind: input, shape index: {}]   ;;  %s479_s4 = inlined_call_operand.<no memory space> [shape: f32[1], index: 4, kind: input, shape index: {}]   ;;  %s480_s5 = inlined_call_operand.hbm [shape: f32[1,128], index: 5, kind: output, shape index: {}]  }
   0x1   :  { %12 = vsyncpa [#allocation7], 0 }
   0x2   :  { %13 = vsyncpa [#allocation5], 0  ;;  %s31_s20 = sshll.u32 %s476_s1, 4  ;;  %s400_s21 = smov [#allocation6]   ;;  %s32_s20 = int_to_ptr.hbm [resolvable:$true] %s31_s20 }
   0x3   :  { %s33_s22 = sshll.u32 %s400_s21, 4  ;;  %s18_s25 = sshll.u32 %s475_s0, 4  ;;  %s34_s22 = int_to_ptr.vmem [resolvable:$true] %s33_s22  ;;  %s19_s25 = int_to_ptr.hbm [resolvable:$true] %s18_s25 }
   0x4   :  { %s401_s26 = smov 128   ;;  %s402_s27 = smov 8  }
   0x5   :  { %39 = dma.hbm_to_vmem [thread:$0]  %s32_s20, 2048, %s34_s22, [#allocation7], %s401_s26, %s401_s26, %s402_s27  }
   0x6   :  { %s403_s28 = smov [#allocation3]   ;;  %s47_s7 = sshll.u32 %s478_s3, 4  ;;  %s48_s7 = int_to_ptr.hbm [resolvable:$true] %s47_s7 }
   0x7   :  { %s20_s29 = sshll.u32 %s403_s28, 4  ;;  %s404_s1 = smov [#allocation8]   ;;  %s21_s29 = int_to_ptr.vmem [resolvable:$true] %s20_s29 }
   0x8   :  { %26 = dma.hbm_to_vmem [thread:$0]  %s19_s25, 2048, %s21_s29, [#allocation4], %s401_s26, %s401_s26, %s402_s27  }
   0x9   :  { %s49_s8 = sshll.u32 %s404_s1, 4  ;;  %s50_s8 = int_to_ptr.vmem [resolvable:$true] %s49_s8 }
   0xa   :  { %52 = dma.hbm_to_vmem [thread:$0]  %s48_s7, 128, %s50_s8, [#allocation7]  }
   0xb   :  { %394 = dma.done.wait [#allocation4], 2048  }
   0xc   :  { %395 = vsyncadd [#allocation4], 4294965248 }
   0xd   :  { %396 = dma.done.wait [#allocation7], 2176  }
   0xe   :  { %397 = vsyncadd [#allocation7], 4294965120  ;;  %v98_v0 = vld [vmem:[#allocation6 + $0x78] sm:$0xff]  ;;  %v97_v1 = vld [vmem:[#allocation6 + $0x70] sm:$0xff]  ;;  %s405_s10 = smov [#allocation9]   ;;  %s248_s14 = sshll.u32 %s480_s5, 4  ;;  %s249_s14 = int_to_ptr.hbm [resolvable:$true] %s248_s14 }
   0xf   :  { %260 = vmatpush.msra.mxu3 %v98_v0  ;;  %259 = vmatpush.msra.mxu2 %v98_v0  ;;  %v96_v2 = vld [vmem:[#allocation6 + $0x68] sm:$0xff]  ;;  %v95_v3 = vld [vmem:[#allocation6 + $0x60] sm:$0xff]  ;;  %v94_v4 = vld [vmem:[#allocation6 + $0x58] sm:$0xff]  ;;  %s246_s11 = sshll.u32 %s405_s10, 4  ;;  %s247_s11 = int_to_ptr.vmem [resolvable:$true] %s246_s11 }
  0x10   :  { %103 = vmatpush.msra.mxu0 %v98_v0  ;;  %v93_v5 = vld [vmem:[#allocation6 + $0x50] sm:$0xff]  ;;  %v92_v6 = vld [vmem:[#allocation6 + $0x48] sm:$0xff]  ;;  %v91_v7 = vld [vmem:[#allocation6 + $0x40] sm:$0xff] }
  0x11   :  { %262 = vmatpush.msra.mxu3 %v97_v1  ;;  %261 = vmatpush.msra.mxu2 %v97_v1  ;;  %v90_v8 = vld [vmem:[#allocation6 + $0x38] sm:$0xff]  ;;  %v89_v9 = vld [vmem:[#allocation6 + $0x30] sm:$0xff]  ;;  %v88_v10 = vld [vmem:[#allocation6 + $0x28] sm:$0xff] }
  0x12   :  { %104 = vmatpush.msra.mxu0 %v97_v1  ;;  %v87_v11 = vld [vmem:[#allocation6 + $0x20] sm:$0xff]  ;;  %v86_v12 = vld [vmem:[#allocation6 + $0x18] sm:$0xff]  ;;  %v85_v13 = vld [vmem:[#allocation6 + $0x10] sm:$0xff] }
  0x13   :  { %264 = vmatpush.msra.mxu3 %v96_v2  ;;  %263 = vmatpush.msra.mxu2 %v96_v2  ;;  %v84_v14 = vld [vmem:[#allocation6 + $0x8] sm:$0xff]  ;;  %v83_v15 = vld [vmem:[#allocation6] sm:$0xff]  ;;  %v78_v16 = vld [vmem:[#allocation3 + $0x58] sm:$0xff] }
  0x14   :  { %105 = vmatpush.msra.mxu0 %v96_v2  ;;  %v72_v17 = vld [vmem:[#allocation3 + $0x28] sm:$0xff]  ;;  %v67_v18 = vld [vmem:[#allocation3] sm:$0xff]  ;;  %v73_v20 = vld [vmem:[#allocation3 + $0x30] sm:$0xff] }
  0x15   :  { %266 = vmatpush.msra.mxu3 %v95_v3  ;;  %265 = vmatpush.msra.mxu2 %v95_v3  ;;  %v79_v19 = vld [vmem:[#allocation3 + $0x60] sm:$0xff]  ;;  %v68_v21 = vld [vmem:[#allocation3 + $0x8] sm:$0xff]  ;;  %v74_v23 = vld [vmem:[#allocation3 + $0x38] sm:$0xff] }
  0x16   :  { %106 = vmatpush.msra.mxu0 %v95_v3  ;;  %v80_v22 = vld [vmem:[#allocation3 + $0x68] sm:$0xff]  ;;  %v69_v24 = vld [vmem:[#allocation3 + $0x10] sm:$0xff]  ;;  %v75_v26 = vld [vmem:[#allocation3 + $0x40] sm:$0xff] }
  0x17   :  { %268 = vmatpush.msra.mxu3 %v94_v4  ;;  %267 = vmatpush.msra.mxu2 %v94_v4  ;;  %v81_v25 = vld [vmem:[#allocation3 + $0x70] sm:$0xff]  ;;  %v70_v27 = vld [vmem:[#allocation3 + $0x18] sm:$0xff]  ;;  %v76_v29 = vld [vmem:[#allocation3 + $0x48] sm:$0xff] }
  0x18   :  { %107 = vmatpush.msra.mxu0 %v94_v4  ;;  %v82_v28 = vld [vmem:[#allocation3 + $0x78] sm:$0xff]  ;;  %v71_v30 = vld [vmem:[#allocation3 + $0x20] sm:$0xff]  ;;  %v77_v31 = vld [vmem:[#allocation3 + $0x50] sm:$0xff] }
  0x19   :  { %270 = vmatpush.msra.mxu3 %v93_v5  ;;  %269 = vmatpush.msra.mxu2 %v93_v5  ;;  %v450_v41 = vld [vmem:[%s477_s2] ss:$0 sm:$0xff] }
  0x1a   :  { %108 = vmatpush.msra.mxu0 %v93_v5 }
  0x1b   :  { %272 = vmatpush.msra.mxu3 %v92_v6  ;;  %271 = vmatpush.msra.mxu2 %v92_v6 }
  0x1c   :  { %109 = vmatpush.msra.mxu0 %v92_v6 }
  0x1d   :  { %274 = vmatpush.msra.mxu3 %v91_v7  ;;  %273 = vmatpush.msra.mxu2 %v91_v7 }
  0x1e   :  { %110 = vmatpush.msra.mxu0 %v91_v7 }
  0x1f   :  { %276 = vmatpush.msra.mxu3 %v90_v8  ;;  %275 = vmatpush.msra.mxu2 %v90_v8 }
  0x20   :  { %111 = vmatpush.msra.mxu0 %v90_v8 }
  0x21   :  { %278 = vmatpush.msra.mxu3 %v89_v9  ;;  %277 = vmatpush.msra.mxu2 %v89_v9 }
  0x22   :  { %112 = vmatpush.msra.mxu0 %v89_v9 }
  0x23   :  { %280 = vmatpush.msra.mxu3 %v88_v10  ;;  %279 = vmatpush.msra.mxu2 %v88_v10 }
  0x24   :  { %113 = vmatpush.msra.mxu0 %v88_v10 }
  0x25   :  { %282 = vmatpush.msra.mxu3 %v87_v11  ;;  %281 = vmatpush.msra.mxu2 %v87_v11 }
  0x26   :  { %114 = vmatpush.msra.mxu0 %v87_v11 }
  0x27   :  { %284 = vmatpush.msra.mxu3 %v86_v12  ;;  %283 = vmatpush.msra.mxu2 %v86_v12 }
  0x28   :  { %115 = vmatpush.msra.mxu0 %v86_v12 }
  0x29   :  { %286 = vmatpush.msra.mxu3 %v85_v13  ;;  %285 = vmatpush.msra.mxu2 %v85_v13 }
  0x2a   :  { %116 = vmatpush.msra.mxu0 %v85_v13 }
  0x2b   :  { %288 = vmatpush.msra.mxu3 %v84_v14  ;;  %287 = vmatpush.msra.mxu2 %v84_v14 }
  0x2c   :  { %117 = vmatpush.msra.mxu0 %v84_v14 }
  0x2d   :  { %290 = vmatpush.msra.mxu3 %v83_v15  ;;  %289 = vmatpush.msra.mxu2 %v83_v15 }
  0x2e   :  { %152 = vmatmul.f32.vlgmr.msra.gmra.mxu3 %v78_v16  ;;  %134 = vmatmul.f32.vlgmr.msra.gmra.mxu2 %v72_v17 }
  0x2f   :  { %118 = vmatpush.msra.mxu0 %v83_v15 }
  0x30   :  { %119 = vmatmul.f32.vlgmr.msra.gmra.mxu0 %v67_v18 }
  0x36   :  { %155 = vmatmul.f32.gmra.mxu3 %v79_v19  ;;  %137 = vmatmul.f32.gmra.mxu2 %v73_v20 }
  0x38   :  { %122 = vmatmul.f32.gmra.mxu0 %v68_v21 }
  0x3e   :  { %158 = vmatmul.f32.gmra.mxu3 %v80_v22  ;;  %140 = vmatmul.f32.gmra.mxu2 %v74_v23 }
  0x40   :  { %125 = vmatmul.f32.gmra.mxu0 %v69_v24 }
  0x46   :  { %161 = vmatmul.f32.gmra.mxu3 %v81_v25  ;;  %143 = vmatmul.f32.gmra.mxu2 %v75_v26 }
  0x48   :  { %128 = vmatmul.f32.gmra.mxu0 %v70_v27 }
  0x4e   :  { %164 = vmatmul.f32.gmra.mxu3 %v82_v28  ;;  %146 = vmatmul.f32.gmra.mxu2 %v76_v29 }
  0x50   :  { %131 = vmatmul.f32.gmra.mxu0 %v71_v30 }
  0x56   :  { %149 = vmatmul.f32.gmra.mxu2 %v77_v31 }
  0xad   :  { %v445_v40 = vpop.f32.mrf.mxu0 }
  0xae   :  { %v121_v27 = vadd.f32 %v450_v41, %v445_v40 }
  0xb0   :  { %v184_v31 = vmul.f32 0.01, %v121_v27  ;;  %vm168_vm15 = vcmp.gt.f32.partialorder %v121_v27, 0.0 }
  0xb1   :  { %v153_v32 = vpop.f32.mrf.mxu3  ;;  %v135_v33 = vpop.f32.mrf.mxu2 }
  0xb2   :  { %v154_v54 = vadd.f32 %v450_v41, %v153_v32  ;;  %v136_v11 = vadd.f32 %v450_v41, %v135_v33  ;;  %v200_v32 = vsel %vm168_vm15, %v121_v27, %v184_v31  ;;  %v216_v33 = vld [vmem:[#allocation8] sm:$0xff] }
  0xb4   :  { %v195_v60 = vmul.f32 0.01, %v154_v54  ;;  %vm179_vm4 = vcmp.gt.f32.partialorder %v154_v54, 0.0  ;;  %v189_v17 = vmul.f32 0.01, %v136_v11  ;;  %vm173_vm10 = vcmp.gt.f32.partialorder %v136_v11, 0.0 }
  0xb5   :  { %v123_v50 = vpop.f32.mrf.mxu0 }
  0xb6   :  { %v211_v63 = vsel %vm179_vm4, %v154_v54, %v195_v60  ;;  %v205_v19 = vsel %vm173_vm10, %v136_v11, %v189_v17  ;;  %v124_v24 = vadd.f32 %v450_v41, %v123_v50 }
  0xb8   :  { %v185_v29 = vmul.f32 0.01, %v124_v24  ;;  %vm169_vm14 = vcmp.gt.f32.partialorder %v124_v24, 0.0 }
  0xb9   :  { %v156_v34 = vpop.f32.mrf.mxu3  ;;  %v138_v35 = vpop.f32.mrf.mxu2 }
  0xba   :  { %v157_v51 = vadd.f32 %v450_v41, %v156_v34  ;;  %v139_v8 = vadd.f32 %v450_v41, %v138_v35  ;;  %v201_v30 = vsel %vm169_vm14, %v124_v24, %v185_v29  ;;  %v238_v34 = vstv %s479_s4 }
  0xbc   :  { %v196_v56 = vmul.f32 0.01, %v157_v51  ;;  %vm180_vm3 = vcmp.gt.f32.partialorder %v157_v51, 0.0  ;;  %v190_v13 = vmul.f32 0.01, %v139_v8  ;;  %vm174_vm9 = vcmp.gt.f32.partialorder %v139_v8, 0.0 }
  0xbd   :  { %v126_v61 = vpop.f32.mrf.mxu0 }
  0xbe   :  { %v212_v59 = vsel %vm180_vm3, %v157_v51, %v196_v56  ;;  %v206_v16 = vsel %vm174_vm9, %v139_v8, %v190_v13  ;;  %v127_v21 = vadd.f32 %v450_v41, %v126_v61 }
  0xc0   :  { %v186_v26 = vmul.f32 0.01, %v127_v21  ;;  %vm170_vm13 = vcmp.gt.f32.partialorder %v127_v21, 0.0 }
  0xc1   :  { %v159_v36 = vpop.f32.mrf.mxu3  ;;  %v141_v37 = vpop.f32.mrf.mxu2 }
  0xc2   :  { %v160_v47 = vadd.f32 %v450_v41, %v159_v36  ;;  %v142_v5 = vadd.f32 %v450_v41, %v141_v37  ;;  %v202_v28 = vsel %vm170_vm13, %v127_v21, %v186_v26 }
  0xc4   :  { %v197_v53 = vmul.f32 0.01, %v160_v47  ;;  %vm181_vm2 = vcmp.gt.f32.partialorder %v160_v47, 0.0  ;;  %v191_v10 = vmul.f32 0.01, %v142_v5  ;;  %vm175_vm8 = vcmp.gt.f32.partialorder %v142_v5, 0.0 }
  0xc5   :  { %v129_v4 = vpop.f32.mrf.mxu0 }
  0xc6   :  { %v213_v55 = vsel %vm181_vm2, %v160_v47, %v197_v53  ;;  %v207_v12 = vsel %vm175_vm8, %v142_v5, %v191_v10  ;;  %v130_v18 = vadd.f32 %v450_v41, %v129_v4 }
  0xc8   :  { %v187_v23 = vmul.f32 0.01, %v130_v18  ;;  %vm171_vm12 = vcmp.gt.f32.partialorder %v130_v18, 0.0 }
  0xc9   :  { %v162_v38 = vpop.f32.mrf.mxu3  ;;  %v144_v39 = vpop.f32.mrf.mxu2 }
  0xca   :  { %v163_v43 = vadd.f32 %v450_v41, %v162_v38  ;;  %v145_v1 = vadd.f32 %v450_v41, %v144_v39  ;;  %v203_v25 = vsel %vm171_vm12, %v130_v18, %v187_v23 }
  0xcc   :  { %v198_v49 = vmul.f32 0.01, %v163_v43  ;;  %vm182_vm1 = vcmp.gt.f32.partialorder %v163_v43, 0.0  ;;  %v192_v7 = vmul.f32 0.01, %v145_v1  ;;  %vm176_vm7 = vcmp.gt.f32.partialorder %v145_v1, 0.0 }
  0xcd   :  { %v132_v14 = vpop.f32.mrf.mxu0 }
  0xce   :  { %v214_v52 = vsel %vm182_vm1, %v163_v43, %v198_v49  ;;  %v208_v9 = vsel %vm176_vm7, %v145_v1, %v192_v7  ;;  %v133_v15 = vadd.f32 %v450_v41, %v132_v14 }
  0xd0   :  { %v188_v20 = vmul.f32 0.01, %v133_v15  ;;  %vm172_vm11 = vcmp.gt.f32.partialorder %v133_v15, 0.0 }
  0xd1   :  { %v165_v42 = vpop.f32.mrf.mxu3  ;;  %v147_v46 = vpop.f32.mrf.mxu2 }
  0xd2   :  { %v166_v44 = vadd.f32 %v450_v41, %v165_v42  ;;  %v148_v62 = vadd.f32 %v450_v41, %v147_v46  ;;  %v204_v22 = vsel %vm172_vm11, %v133_v15, %v188_v20 }
  0xd4   :  { %vm183_vm0 = vcmp.gt.f32.partialorder %v166_v44, 0.0  ;;  %v199_v45 = vmul.f32 0.01, %v166_v44  ;;  %v193_v3 = vmul.f32 0.01, %v148_v62  ;;  %vm177_vm6 = vcmp.gt.f32.partialorder %v148_v62, 0.0 }
  0xd6   :  { %v215_v48 = vsel %vm183_vm0, %v166_v44, %v199_v45  ;;  %v209_v6 = vsel %vm177_vm6, %v148_v62, %v193_v3 }
  0xd7   :  { %217 = vmatpush.xpose.msra.mxu1 %v215_v48 }
  0xd9   :  { %v150_v57 = vpop.f32.mrf.mxu2 }
  0xda   :  { %v151_v58 = vadd.f32 %v450_v41, %v150_v57 }
  0xdb   :  { %218 = vmatpush.xpose.msra.mxu1 %v214_v52 }
  0xdc   :  { %v194_v0 = vmul.f32 0.01, %v151_v58  ;;  %vm178_vm5 = vcmp.gt.f32.partialorder %v151_v58, 0.0 }
  0xde   :  { %v210_v2 = vsel %vm178_vm5, %v151_v58, %v194_v0 }
  0xdf   :  { %219 = vmatpush.xpose.msra.mxu1 %v213_v55 }
  0xe3   :  { %220 = vmatpush.xpose.msra.mxu1 %v212_v59 }
  0xe7   :  { %221 = vmatpush.xpose.msra.mxu1 %v211_v63 }
  0xeb   :  { %222 = vmatpush.xpose.msra.mxu1 %v210_v2 }
  0xef   :  { %223 = vmatpush.xpose.msra.mxu1 %v209_v6 }
  0xf3   :  { %224 = vmatpush.xpose.msra.mxu1 %v208_v9 }
  0xf7   :  { %225 = vmatpush.xpose.msra.mxu1 %v207_v12 }
  0xfb   :  { %226 = vmatpush.xpose.msra.mxu1 %v206_v16 }
  0xff   :  { %227 = vmatpush.xpose.msra.mxu1 %v205_v19 }
 0x103   :  { %228 = vmatpush.xpose.msra.mxu1 %v204_v22 }
 0x107   :  { %229 = vmatpush.xpose.msra.mxu1 %v203_v25 }
 0x10b   :  { %230 = vmatpush.xpose.msra.mxu1 %v202_v28 }
 0x10f   :  { %231 = vmatpush.xpose.msra.mxu1 %v201_v30 }
 0x113   :  { %232 = vmatpush.xpose.msra.mxu1 %v200_v32 }
 0x116   :  { %233 = vmatmul.f32.vlgmr.msra.gmra.mxu1 %v216_v33 }
 0x193   :  { %v234_v35 = vpop.f32.mrf.mxu1 }
 0x194   :  { %v239_v36 = vadd.f32 %v238_v34, %v234_v35 }
 0x196   :  { %240 = vst [vmem:[#allocation9] sm:$0x1] %v239_v36 }
 0x197   :  { %251 = dma.vmem_to_hbm [thread:$0]  %s247_s11, 16, %s249_s14, [#allocation5]  }
 0x198   :  { %398 = dma.done.wait [#allocation5], 16  }
 0x199   :  { %399 = vsyncadd [#allocation5], 4294967280 }
 0x19a   :  { %256 = vsyncpa [#allocation4], 1 }
 0x19b   :  { %257 = vsyncpa [#allocation7], 1 }
 0x19c   :  { %258 = vsyncpa [#allocation5], 1 }

</bundles_post_ra>
